<compile_context>
chip_gen: v7x
topology: tpu7x:2x2x1
jax: 0.10.0
libtpu: 0.0.40
codegen_flags: <defaults>
</compile_context>

<pallas_src>
import jax
import jax.numpy as jnp
from jax.experimental import pallas as pl
from jax.experimental.pallas import tpu as pltpu

LANE = 128


def _round_up(n, m):
    return ((n + m - 1) // m) * m


def _cdiv(a, b):
    return (a + b - 1) // b


def _pad_to(a, rows, cols):
    r, c = a.shape
    if r == rows and c == cols:
        return a
    return jnp.pad(a, ((0, rows - r), (0, cols - c)))


def prepare_params(params, *, compute_dtype=jnp.bfloat16):
    """One-time weight prep (keep OUT of the per-step hot path):
      - weights stored (in, out), hidden dims zero-padded to 128 lanes, cast to
        the MXU compute dtype (output dim of W3 left unpadded),
      - the three biases padded + stacked into one (3, Pmax) f32 array so the
        kernel gets them in a single tiny DMA per grid step.
    Padded hidden columns stay exactly zero through relu, so results match."""
    w1, b1, w2, b2, w3, b3 = (params[k] for k in ("w1", "b1", "w2", "b2", "w3", "b3"))
    S, H1 = w1.shape
    H2 = w2.shape[1]
    A = w3.shape[1]
    H1p = _round_up(H1, LANE)
    H2p = _round_up(H2, LANE)
    Pmax = max(H1p, H2p, _round_up(A, LANE))

    w1p = _pad_to(w1, S, H1p).astype(compute_dtype)
    w2p = _pad_to(w2, H1p, H2p).astype(compute_dtype)
    w3p = _pad_to(w3, H2p, A).astype(compute_dtype)  # output dim unpadded
    b_all = jnp.concatenate(
        [_pad_to(b1, 1, Pmax), _pad_to(b2, 1, Pmax), _pad_to(b3, 1, Pmax)], axis=0
    ).astype(jnp.float32)

    return {
        "w1p": w1p, "w2p": w2p, "w3p": w3p, "b_all": b_all,
        "dims": (S, H1p, H2p, A, Pmax),
        "compute_dtype": compute_dtype,
    }


def _choose_tile_b(B, max_rows=2048):
    """Single grid step by default (1-TC v5e/v6e: every extra step is ~0.35 us
    of pure overhead).  For large batches, split into the smallest EVEN number
    of <=max_rows tiles (multiple of 8 rows) so v7x's two TensorCores each get
    balanced work and f32 intermediates stay well under VMEM."""
    if B <= max_rows:
        return _round_up(max(B, 8), 8)
    n_steps = 2
    while _cdiv(B, n_steps) > max_rows:
        n_steps += 2
    return _round_up(_cdiv(B, n_steps), 8)


def actor_forward(x, prepped, *, tile_b=None):
    """x: (B, state_dim) float32.  prepped: output of prepare_params()."""
    S, H1p, H2p, A, Pmax = prepped["dims"]
    compute_dtype = prepped["compute_dtype"]
    w1p, w2p, w3p, b_all = (prepped[k] for k in ("w1p", "w2p", "w3p", "b_all"))

    B, Sx = x.shape
    assert Sx == S, "state_dim mismatch between x and params"

    if tile_b is None:
        tile_b = _choose_tile_b(B)
    assert tile_b % 8 == 0, "tile_b must be a multiple of 8 sublanes"

    # Pad the batch (rows) only when it doesn't divide the tile; padded rows
    # are dropped after the call.
    Bp = _round_up(B, tile_b)
    if Bp != B:
        x = jnp.pad(x, ((0, Bp - B), (0, 0)))

    def kernel(x_ref, w1_ref, w2_ref, w3_ref, b_ref, o_ref):
        xt = x_ref[...].astype(compute_dtype)  # cast on the VPU; free (mem-bound)
        h1 = jnp.dot(xt, w1_ref[...], preferred_element_type=jnp.float32)
        h1 = jnp.maximum(h1 + b_ref[0:1, :H1p], 0.0).astype(compute_dtype)
        h2 = jnp.dot(h1, w2_ref[...], preferred_element_type=jnp.float32)
        h2 = jnp.maximum(h2 + b_ref[1:2, :H2p], 0.0).astype(compute_dtype)
        h3 = jnp.dot(h2, w3_ref[...], preferred_element_type=jnp.float32)
        o_ref[...] = jnp.tanh(h3 + b_ref[2:3, :A]).astype(o_ref.dtype)

    grid = (Bp // tile_b,)
    in_specs = [
        pl.BlockSpec((tile_b, S), lambda i: (i, 0)),   # batch-tiled activations (f32)
        pl.BlockSpec((S, H1p), lambda i: (0, 0)),      # grid-invariant weight blocks
        pl.BlockSpec((H1p, H2p), lambda i: (0, 0)),
        pl.BlockSpec((H2p, A), lambda i: (0, 0)),
        pl.BlockSpec((3, Pmax), lambda i: (0, 0)),     # stacked biases: one DMA
    ]
    out_spec = pl.BlockSpec((tile_b, A), lambda i: (i, 0))  # UNPADDED output writeback

    out = pl.pallas_call(
        kernel,
        out_shape=jax.ShapeDtypeStruct((Bp, A), jnp.float32),
        grid=grid,
        in_specs=in_specs,
        out_specs=out_spec,
        compiler_params=pltpu.CompilerParams(
            dimension_semantics=("parallel",),
            vmem_limit_bytes=8 * 1024 * 1024,
        ),
    )(x, w1p, w2p, w3p, b_all)

    return out if Bp == B else out[:B]


def init_actor_params(key, state_dim, hidden1, hidden2, action_dim):
    """Deterministic init mimicking torch.nn.Linear default
    (U[-1/sqrt(fan_in), 1/sqrt(fan_in)]).  Weights stored (in, out)."""
    keys = jax.random.split(key, 6)

    def lin(kw, kb, fan_in, fan_out):
        bound = 1.0 / jnp.sqrt(jnp.float32(fan_in))
        w = jax.random.uniform(kw, (fan_in, fan_out), jnp.float32, -bound, bound)
        b = jax.random.uniform(kb, (1, fan_out), jnp.float32, -bound, bound)
        return w, b

    w1, b1 = lin(keys[0], keys[1], state_dim, hidden1)
    w2, b2 = lin(keys[2], keys[3], hidden1, hidden2)
    w3, b3 = lin(keys[4], keys[5], hidden2, action_dim)
    return {"w1": w1, "b1": b1, "w2": w2, "b2": b2, "w3": w3, "b3": b3}


def actor_forward_ref(x, p):
    h1 = jax.nn.relu(x @ p["w1"] + p["b1"])
    h2 = jax.nn.relu(h1 @ p["w2"] + p["b2"])
    return jnp.tanh(h2 @ p["w3"] + p["b3"])


if __name__ == "__main__":
    # Small shapes consistent with the module: state_dim=16, hidden=(64, 64), action_dim=4.
    key = jax.random.PRNGKey(0)
    k_x, k_p, k_x2, k_x3 = jax.random.split(key, 4)

    batch, state_dim, hidden1, hidden2, action_dim = 8, 16, 64, 64, 4
    x = jax.random.normal(k_x, (batch, state_dim), jnp.float32)
    params = init_actor_params(k_p, state_dim, hidden1, hidden2, action_dim)
    ref = actor_forward_ref(x, params)

    # Exact-precision path (f32 MXU inputs) — tight tolerance.
    prep_f32 = prepare_params(params, compute_dtype=jnp.float32)
    out_f32 = jax.block_until_ready(actor_forward(x, prep_f32))
    assert out_f32.shape == (batch, action_dim)
    assert jnp.allclose(out_f32, ref, atol=1e-5, rtol=1e-5), "f32 mismatch vs JAX reference"

    # Fast path (bf16 MXU inputs, f32 accumulation) — prep done once, reused below.
    prep_bf16 = prepare_params(params)  # compute_dtype=bf16
    out_bf16 = jax.block_until_ready(actor_forward(x, prep_bf16))
    assert jnp.allclose(out_bf16, ref, atol=5e-2), "bf16 mismatch vs JAX reference"

    # Larger batch: single full-batch grid step (1-TC v5e/v6e sweet spot).
    x2 = jax.random.normal(k_x2, (1024, state_dim), jnp.float32)
    ref2 = actor_forward_ref(x2, params)
    out2 = jax.block_until_ready(actor_forward(x2, prep_bf16))
    assert out2.shape == (1024, action_dim)
    assert jnp.allclose(out2, ref2, atol=5e-2), "B=1024 bf16 mismatch vs JAX reference"

    # Uneven large batch: exercises batch padding + the 2-step balanced grid
    # (dual-TC v7x megacore path).
    x3 = jax.random.normal(k_x3, (4004, state_dim), jnp.float32)
    ref3 = actor_forward_ref(x3, params)
    out3 = jax.block_until_ready(actor_forward(x3, prep_bf16))
    assert out3.shape == (4004, action_dim)
    assert jnp.allclose(out3, ref3, atol=5e-2), "uneven-batch bf16 mismatch vs JAX reference"

    print("KERNEL_OK")
</pallas_src>

<mosaic_0001>
module attributes {stable_mosaic.version = 11 : i64} {
  func.func @kernel(%arg0: i32, %arg1: memref<8x16xf32, #tpu.memory_space<vmem>>, %arg2: memref<16x128xf32, #tpu.memory_space<vmem>>, %arg3: memref<128x128xf32, #tpu.memory_space<vmem>>, %arg4: memref<128x4xf32, #tpu.memory_space<vmem>>, %arg5: memref<3x128xf32, #tpu.memory_space<vmem>>, %arg6: memref<8x4xf32, #tpu.memory_space<vmem>>) attributes {dimension_semantics = [#tpu.dimension_semantics<parallel>], iteration_bounds = array<i64: 1>, scalar_prefetch = 0 : i64, scratch_operands = 0 : i64, tpu.core_type = #tpu.core_type<tc>, window_params = [{transform_indices = @transform_0, window_bounds = array<i64: 8, 16>}, {pipeline_mode = #tpu.pipeline_mode<synchronous>, transform_indices = @transform_1, window_bounds = array<i64: 16, 128>}, {pipeline_mode = #tpu.pipeline_mode<synchronous>, transform_indices = @transform_2, window_bounds = array<i64: 128, 128>}, {pipeline_mode = #tpu.pipeline_mode<synchronous>, transform_indices = @transform_3, window_bounds = array<i64: 128, 4>}, {pipeline_mode = #tpu.pipeline_mode<synchronous>, transform_indices = @transform_4, window_bounds = array<i64: 3, 128>}, {transform_indices = @transform_5, window_bounds = array<i64: 8, 4>}]} {
    %c0 = arith.constant 0 : index
    %c0_0 = arith.constant 0 : index
    %0 = vector.load %arg1[%c0, %c0_0] : memref<8x16xf32, #tpu.memory_space<vmem>>, vector<8x16xf32>
    %c0_1 = arith.constant 0 : index
    %c0_2 = arith.constant 0 : index
    %1 = vector.load %arg2[%c0_1, %c0_2] : memref<16x128xf32, #tpu.memory_space<vmem>>, vector<16x128xf32>
    %cst = arith.constant dense<0.000000e+00> : vector<8x128xf32>
    %2 = tpu.matmul %0, %1, %cst {dimension_numbers = #tpu.dot_dimension_numbers<[1], [0], [0], [1], [0, 0, 1, 1], [], []>} : vector<8x16xf32>, vector<16x128xf32>, vector<8x128xf32> -> vector<8x128xf32>
    %c0_3 = arith.constant 0 : index
    %c0_4 = arith.constant 0 : index
    %3 = vector.load %arg5[%c0_3, %c0_4] : memref<3x128xf32, #tpu.memory_space<vmem>>, vector<1x128xf32>
    %4 = vector.broadcast %3 : vector<1x128xf32> to vector<8x128xf32>
    %5 = arith.addf %2, %4 : vector<8x128xf32>
    %cst_5 = arith.constant 0.000000e+00 : f32
    %6 = vector.broadcast %cst_5 : f32 to vector<8x128xf32>
    %7 = arith.maximumf %5, %6 : vector<8x128xf32>
    %c0_6 = arith.constant 0 : index
    %c0_7 = arith.constant 0 : index
    %8 = vector.load %arg3[%c0_6, %c0_7] : memref<128x128xf32, #tpu.memory_space<vmem>>, vector<128x128xf32>
    %cst_8 = arith.constant dense<0.000000e+00> : vector<8x128xf32>
    %9 = tpu.matmul %7, %8, %cst_8 {dimension_numbers = #tpu.dot_dimension_numbers<[1], [0], [0], [1], [0, 0, 1, 1], [], []>} : vector<8x128xf32>, vector<128x128xf32>, vector<8x128xf32> -> vector<8x128xf32>
    %c1 = arith.constant 1 : index
    %c0_9 = arith.constant 0 : index
    %10 = vector.load %arg5[%c1, %c0_9] : memref<3x128xf32, #tpu.memory_space<vmem>>, vector<1x128xf32>
    %11 = vector.broadcast %10 : vector<1x128xf32> to vector<8x128xf32>
    %12 = arith.addf %9, %11 : vector<8x128xf32>
    %cst_10 = arith.constant 0.000000e+00 : f32
    %13 = vector.broadcast %cst_10 : f32 to vector<8x128xf32>
    %14 = arith.maximumf %12, %13 : vector<8x128xf32>
    %c0_11 = arith.constant 0 : index
    %c0_12 = arith.constant 0 : index
    %15 = vector.load %arg4[%c0_11, %c0_12] : memref<128x4xf32, #tpu.memory_space<vmem>>, vector<128x4xf32>
    %cst_13 = arith.constant dense<0.000000e+00> : vector<8x4xf32>
    %16 = tpu.matmul %14, %15, %cst_13 {dimension_numbers = #tpu.dot_dimension_numbers<[1], [0], [0], [1], [0, 0, 1, 1], [], []>} : vector<8x128xf32>, vector<128x4xf32>, vector<8x4xf32> -> vector<8x4xf32>
    %c2 = arith.constant 2 : index
    %c0_14 = arith.constant 0 : index
    %17 = vector.load %arg5[%c2, %c0_14] : memref<3x128xf32, #tpu.memory_space<vmem>>, vector<1x4xf32>
    %18 = vector.broadcast %17 : vector<1x4xf32> to vector<8x4xf32>
    %19 = arith.addf %16, %18 : vector<8x4xf32>
    %20 = math.tanh %19 : vector<8x4xf32>
    %c0_15 = arith.constant 0 : index
    %c0_16 = arith.constant 0 : index
    %21 = vector.load %arg6[%c0_15, %c0_16] : memref<8x4xf32, #tpu.memory_space<vmem>>, vector<8x4xf32>
    tpu.vector_store %arg6[%c0_15, %c0_16], %20 {strides = array<i32>} : memref<8x4xf32, #tpu.memory_space<vmem>>, vector<8x4xf32>,
    return
  }
  func.func @transform_0(%arg0: i32) -> (i32, i32) {
    %c0_i32 = arith.constant 0 : i32
    %c0_i32_0 = arith.constant 0 : i32
    return %arg0, %c0_i32 : i32, i32
  }
  func.func @transform_1(%arg0: i32) -> (i32, i32) {
    %c0_i32 = arith.constant 0 : i32
    %c0_i32_0 = arith.constant 0 : i32
    %c0_i32_1 = arith.constant 0 : i32
    return %c0_i32, %c0_i32_0 : i32, i32
  }
  func.func @transform_2(%arg0: i32) -> (i32, i32) {
    %c0_i32 = arith.constant 0 : i32
    %c0_i32_0 = arith.constant 0 : i32
    %c0_i32_1 = arith.constant 0 : i32
    return %c0_i32, %c0_i32_0 : i32, i32
  }
  func.func @transform_3(%arg0: i32) -> (i32, i32) {
    %c0_i32 = arith.constant 0 : i32
    %c0_i32_0 = arith.constant 0 : i32
    %c0_i32_1 = arith.constant 0 : i32
    return %c0_i32, %c0_i32_0 : i32, i32
  }
  func.func @transform_4(%arg0: i32) -> (i32, i32) {
    %c0_i32 = arith.constant 0 : i32
    %c0_i32_0 = arith.constant 0 : i32
    %c0_i32_1 = arith.constant 0 : i32
    return %c0_i32, %c0_i32_0 : i32, i32
  }
  func.func @transform_5(%arg0: i32) -> (i32, i32) {
    %c0_i32 = arith.constant 0 : i32
    %c0_i32_0 = arith.constant 0 : i32
    return %arg0, %c0_i32 : i32, i32
  }
}

</mosaic_0001>

<bundles_post_ra>
// kernel: tpu_custom_call.1
= control target key start
LH: loop header
LB: loop body
LE: loop exit
PB: predicated region body
PF: predicated region fallthrough
CT: control target
= control target key end

     0   :  { %10 = vsyncpa [#allocation3], 0  ;;  %s509_s18 = smov [#allocation2]   ;;  %s688_s0 = inlined_call_operand.vmem [shape: f32[8,16], index: 0, kind: input, shape index: {}]   ;;  %s689_s1 = inlined_call_operand.hbm [shape: f32[16,128], index: 1, kind: input, shape index: {}]   ;;  %s690_s2 = inlined_call_operand.vmem [shape: f32[128,128], index: 2, kind: input, shape index: {}]   ;;  %s691_s3 = inlined_call_operand.vmem [shape: f32[128,4], index: 3, kind: input, shape index: {}]   ;;  %s692_s4 = inlined_call_operand.vmem [shape: f32[3,128], index: 4, kind: input, shape index: {}]   ;;  %s693_s5 = inlined_call_operand.vmem [shape: f32[8,4], index: 5, kind: output, shape index: {}]  }
   0x1   :  { %s18_s19 = sshll.u32 %s509_s18, 4  ;;  %s485_s22 = scalar_lea.hbm %s689_s1, 256  ;;  %s19_s19 = int_to_ptr.vmem [resolvable:$true] %s18_s19 }
   0x2   :  { %p486_p0 = scmp.ne.s32.totalorder %s689_s1, %s485_s22  ;;  %p489_p1 = scmp.lt.u32.totalorder %s485_s22, %s689_s1 }
   0x4   :  { %p491_p2 = pnand %p489_p1, %p486_p0 }
   0x6   :  { %494 = shalt.err (!%p491_p2)
}
   0x7   :  { %s495_s27 = scalar_lea.vmem %s19_s19, 256  ;;  %p500_p4 = scmp.lt.s32.totalorder %s19_s19, %s19_s19 }
   0x8   :  { %p496_p3 = scmp.ne.s32.totalorder %s19_s19, %s495_s27  ;;  %p501_p5 = scmp.lt.s32.totalorder %s495_s27, %s495_s27 }
   0xa   :  { %p502_p6 = por %p501_p5, %p500_p4 }
   0xc   :  { %p503_p7 = pnand %p502_p6, %p496_p3 }
   0xe   :  { %506 = shalt.err (!%p503_p7)
}
   0xf   :  { %s510_s28 = smov 128   ;;  %s511_s29 = smov 8  }
  0x10   :  { %24 = dma.hbm_to_vmem [thread:$0]  %s689_s1, 256, %s19_s19, [#allocation3], %s510_s28, %s510_s28, %s511_s29  }
  0x11   :  { %507 = dma.done.wait [#allocation3], 256  }
  0x12   :  { %508 = vsyncadd [#allocation3], 4294967040  ;;  %v512_v0 = vmov 0.0|0.0   ;;  %vm513_vm0 = vmmov 0   ;;  %v514_v1 = vmov 0.0   ;;  %v35_v2 = vld [vmem:[#allocation2] sm:$0xff] }
  0x13   :  { %426 = vmatprep.subr.bf16.mxu0 %v512_v0  ;;  %353 = vmatprep.mubr.msk.f32.mxu0 %vm513_vm0, %v514_v1  ;;  %v36_v3 = vld [vmem:[#allocation2 + $0x8] sm:$0xff]  ;;  %v117_v5 = vld [vmem:[%s690_s2] sm:$0xff]  ;;  %v119_v7 = vld [vmem:[%s690_s2 + $0x10] sm:$0xff]  ;;  %vm42_vm1 = vcmask 130048   ;;  %vm301_vm2 = vcmask 31744  }
  0x14   :  { %429 = vmatprep.subr.bf16.mxu1 %v512_v0  ;;  %388 = vmatprep.mubr.msk.f32.mxu1 %vm513_vm0, %v514_v1  ;;  %v427_v4 = vpack.c.bf16 %v36_v3, %v35_v2  ;;  %v118_v6 = vld [vmem:[%s690_s2 + $0x8] sm:$0xff]  ;;  %v120_v9 = vld [vmem:[%s690_s2 + $0x18] sm:$0xff]  ;;  %v34_v10 = vld [vmem:[%s688_s0] sm:$0xff] }
  0x15   :  { %v430_v8 = vpack.c.bf16 %v118_v6, %v117_v5  ;;  %v433_v11 = vpack.c.bf16 %v120_v9, %v119_v7  ;;  %v121_v12 = vld [vmem:[%s690_s2 + $0x20] sm:$0xff]  ;;  %v122_v13 = vld [vmem:[%s690_s2 + $0x28] sm:$0xff]  ;;  %v123_v15 = vld [vmem:[%s690_s2 + $0x30] sm:$0xff] }
  0x16   :  { %428 = vmatpush3.bf16.msra.mxu0 %v427_v4  ;;  %v436_v14 = vpack.c.bf16 %v122_v13, %v121_v12  ;;  %v124_v16 = vld [vmem:[%s690_s2 + $0x38] sm:$0xff]  ;;  %v125_v18 = vld [vmem:[%s690_s2 + $0x40] sm:$0xff]  ;;  %v126_v19 = vld [vmem:[%s690_s2 + $0x48] sm:$0xff] }
  0x17   :  { %431 = vmatpush3.bf16.msra.mxu1 %v430_v8  ;;  %453 = vmatprep.subr.bf16.mxu0 %v512_v0  ;;  %v439_v17 = vpack.c.bf16 %v124_v16, %v123_v15  ;;  %v442_v20 = vpack.c.bf16 %v126_v19, %v125_v18  ;;  %v127_v21 = vld [vmem:[%s690_s2 + $0x50] sm:$0xff]  ;;  %v128_v22 = vld [vmem:[%s690_s2 + $0x58] sm:$0xff]  ;;  %v129_v24 = vld [vmem:[%s690_s2 + $0x60] sm:$0xff] }
  0x18   :  { %432 = vmatprep.subr.bf16.mxu1 %v512_v0  ;;  %v445_v23 = vpack.c.bf16 %v128_v22, %v127_v21  ;;  %v130_v25 = vld [vmem:[%s690_s2 + $0x68] sm:$0xff]  ;;  %v131_v27 = vld [vmem:[%s690_s2 + $0x70] sm:$0xff]  ;;  %v132_v28 = vld [vmem:[%s690_s2 + $0x78] sm:$0xff] }
  0x19   :  { %354 = vmatmul.mubr.msk.f32.vlgmr.msra.gmra.mrb[0].mxu0 %vm42_vm1, %v34_v10  ;;  %v448_v26 = vpack.c.bf16 %v130_v25, %v129_v24  ;;  %v451_v29 = vpack.c.bf16 %v132_v28, %v131_v27  ;;  %v209_v30 = vld [vmem:[%s691_s3] sm:$0xff]  ;;  %v210_v31 = vld [vmem:[%s691_s3 + $0x8] sm:$0xff]  ;;  %v211_v32 = vld [vmem:[%s691_s3 + $0x10] sm:$0xff] }
  0x1a   :  { %423 = vmatprep.mubr.msk.f32.mxu0 %vm513_vm0, %v514_v1  ;;  %v454_v33 = vpack.c.bf16 %v210_v31, %v209_v30  ;;  %v212_v34 = vld [vmem:[%s691_s3 + $0x18] sm:$0xff]  ;;  %v213_v36 = vld [vmem:[%s691_s3 + $0x20] sm:$0xff]  ;;  %v214_v37 = vld [vmem:[%s691_s3 + $0x28] sm:$0xff] }
  0x1b   :  { %434 = vmatpush3.bf16.msra.mxu1 %v433_v11  ;;  %v457_v35 = vpack.c.bf16 %v212_v34, %v211_v32  ;;  %v460_v38 = vpack.c.bf16 %v214_v37, %v213_v36  ;;  %v215_v39 = vld [vmem:[%s691_s3 + $0x30] sm:$0xff]  ;;  %v216_v40 = vld [vmem:[%s691_s3 + $0x38] sm:$0xff]  ;;  %v217_v42 = vld [vmem:[%s691_s3 + $0x40] sm:$0xff] }
  0x1c   :  { %435 = vmatprep.subr.bf16.mxu1 %v512_v0  ;;  %455 = vmatpush3.bf16.msra.mxu0 %v454_v33  ;;  %v463_v41 = vpack.c.bf16 %v216_v40, %v215_v39  ;;  %v218_v43 = vld [vmem:[%s691_s3 + $0x48] sm:$0xff]  ;;  %v219_v45 = vld [vmem:[%s691_s3 + $0x50] sm:$0xff]  ;;  %v220_v46 = vld [vmem:[%s691_s3 + $0x58] sm:$0xff] }
  0x1d   :  { %456 = vmatprep.subr.bf16.mxu0 %v512_v0  ;;  %v466_v44 = vpack.c.bf16 %v218_v43, %v217_v42  ;;  %v469_v47 = vpack.c.bf16 %v220_v46, %v219_v45  ;;  %v221_v48 = vld [vmem:[%s691_s3 + $0x60] sm:$0xff]  ;;  %v222_v49 = vld [vmem:[%s691_s3 + $0x68] sm:$0xff]  ;;  %v223_v56 = vld [vmem:[%s691_s3 + $0x70] sm:$0xff] }
  0x1e   :  { %v472_v50 = vpack.c.bf16 %v222_v49, %v221_v48  ;;  %v308_v51 = vld [vmem:[%s692_s4] ss:$0 sm:$0xff]  ;;  %v224_v57 = vld [vmem:[%s691_s3 + $0x78] sm:$0xff]  ;;  %v310_v59 = vld [vmem:[%s692_s4 + $0x1] ss:$0 sm:$0xff] }
  0x1f   :  { %437 = vmatpush3.bf16.msra.mxu1 %v436_v14  ;;  %v475_v58 = vpack.c.bf16 %v224_v57, %v223_v56 }
  0x20   :  { %438 = vmatprep.subr.bf16.mxu1 %v512_v0  ;;  %458 = vmatpush3.bf16.msra.mxu0 %v457_v35 }
  0x21   :  { %459 = vmatprep.subr.bf16.mxu0 %v512_v0 }
  0x23   :  { %440 = vmatpush3.bf16.msra.mxu1 %v439_v17 }
  0x24   :  { %441 = vmatprep.subr.bf16.mxu1 %v512_v0  ;;  %461 = vmatpush3.bf16.msra.mxu0 %v460_v38 }
  0x25   :  { %462 = vmatprep.subr.bf16.mxu0 %v512_v0 }
  0x27   :  { %443 = vmatpush3.bf16.msra.mxu1 %v442_v20 }
  0x28   :  { %444 = vmatprep.subr.bf16.mxu1 %v512_v0  ;;  %464 = vmatpush3.bf16.msra.mxu0 %v463_v41 }
  0x29   :  { %465 = vmatprep.subr.bf16.mxu0 %v512_v0 }
  0x2b   :  { %446 = vmatpush3.bf16.msra.mxu1 %v445_v23 }
  0x2c   :  { %447 = vmatprep.subr.bf16.mxu1 %v512_v0  ;;  %467 = vmatpush3.bf16.msra.mxu0 %v466_v44 }
  0x2d   :  { %468 = vmatprep.subr.bf16.mxu0 %v512_v0 }
  0x2f   :  { %449 = vmatpush3.bf16.msra.mxu1 %v448_v26 }
  0x30   :  { %450 = vmatprep.subr.bf16.mxu1 %v512_v0  ;;  %470 = vmatpush3.bf16.msra.mxu0 %v469_v47 }
  0x31   :  { %471 = vmatprep.subr.bf16.mxu0 %v512_v0 }
  0x33   :  { %452 = vmatpush3.bf16.msra.mxu1 %v451_v29 }
  0x34   :  { %473 = vmatpush3.bf16.msra.mxu0 %v472_v50 }
  0x35   :  { %474 = vmatprep.subr.bf16.mxu0 %v512_v0  ;;  %v311_v0 = vld [vmem:[%s692_s4 + $0x2] ss:$0 sm:$0xff] }
  0x38   :  { %476 = vmatpush3.bf16.msra.mxu0 %v475_v58 }
  0xec   :  { %v112_v52 = vpop.f32.mrb[0].mxu0 }
  0xed   :  { %v113_v53 = vadd.f32 %v308_v51, %v112_v52  ;;  %v355_v54 = vpop.f32.mrb[1].mxu0 }
  0xef   :  { %v116_v55 = vmax.f32 %v113_v53, 0.0 }
  0xf1   :  { %389 = vmatmul.mubr.f32.vlgmr.msra.gmra.mrb[0].mxu1 %v116_v55 }
 0x1c4   :  { %v204_v60 = vpop.f32.mrb[0].mxu1 }
 0x1c5   :  { %v205_v61 = vadd.f32 %v310_v59, %v204_v60  ;;  %v390_v62 = vpop.f32.mrb[1].mxu1 }
 0x1c7   :  { %v208_v63 = vmax.f32 %v205_v61, 0.0 }
 0x1c9   :  { %424 = vmatmul.mubr.f32.vlgmr.msra.gmra.mrb[2].mxu0 %v208_v63 }
 0x29c   :  { %v296_v1 = vpop.f32.mrb[2].mxu0 }
 0x29d   :  { %v297_v2 = vadd.f32 %v311_v0, %v296_v1  ;;  %v425_v3 = vpop.f32.mrb[3].mxu0 }
 0x29f   :  { %483 = vtanh.f32 %v297_v2 }
 0x2a9   :  { %v484_v4 = vpop.eup %483 }
 0x2aa   :  { %302 = vst.msk [vmem:[%s693_s5] sm:$0xff] %vm301_vm2, %v484_v4 }
 0x2ab   :  { %307 = vsyncpa [#allocation3], 1 }

</bundles_post_ra>
